<compile_context>
chip_gen: v7x
topology: tpu7x:2x2x1
jax: 0.10.0
libtpu: 0.0.40
codegen_flags: <defaults>
</compile_context>

<pallas_src>
import jax
import jax.numpy as jnp
from jax.experimental import pallas as pl
from jax.experimental.pallas import tpu as pltpu


def _concat_kernel(x12_ref, o_ref):
    # Input: (4, 7) = rows of x1 stacked over rows of x2.
    # Output: (12, 14) = tile the slab 3x along rows, 2x along columns.
    o_ref[...] = jnp.tile(x12_ref[...], (3, 2))


def model_forward(x1, x2):
    out_dtype = jnp.result_type(x1.dtype, x2.dtype)
    # Pre-stack in the wrapper: one inbound DMA instead of two.
    x12 = jnp.concatenate([x1.astype(out_dtype), x2.astype(out_dtype)], axis=0)
    R2, C = x12.shape                       # (4, 7)
    out_shape = (3 * R2, 2 * C)             # (12, 14)
    n_bytes = (x12.size + out_shape[0] * out_shape[1]) * jnp.dtype(out_dtype).itemsize
    return pl.pallas_call(
        _concat_kernel,
        out_shape=jax.ShapeDtypeStruct(out_shape, out_dtype),
        in_specs=[pl.BlockSpec(memory_space=pltpu.MemorySpace.VMEM)],
        out_specs=pl.BlockSpec(memory_space=pltpu.MemorySpace.VMEM),
        cost_estimate=pl.CostEstimate(
            flops=0, transcendentals=0, bytes_accessed=int(n_bytes)),
    )(x12)


if __name__ == "__main__":
    key = jax.random.PRNGKey(0)
    k1, k2 = jax.random.split(key)
    x1 = jax.random.normal(k1, (2, 7), dtype=jnp.float32)
    x2 = jax.random.normal(k2, (2, 7), dtype=jnp.float32)

    out = model_forward(x1, x2)
    out = jax.block_until_ready(out)

    # Pure-JAX reference check (matches the PyTorch module).
    v = jnp.concatenate([x1, x2, x1, x2, x1, x2], axis=0)
    ref = jnp.concatenate([v, v], axis=1)
    assert out.shape == (12, 14), out.shape
    assert jnp.allclose(out, ref), "mismatch vs reference"

    print("KERNEL_OK")
</pallas_src>

<mosaic_0001>
module attributes {stable_mosaic.version = 11 : i64} {
  func.func @_concat_kernel(%arg0: memref<4x7xf32, #tpu.memory_space<vmem>>, %arg1: memref<12x14xf32, #tpu.memory_space<vmem>>) attributes {dimension_semantics = [], scalar_prefetch = 0 : i64, scratch_operands = 0 : i64, tpu.core_type = #tpu.core_type<tc>} {
    %c0 = arith.constant 0 : index
    %c0_0 = arith.constant 0 : index
    %0 = vector.load %arg0[%c0, %c0_0] : memref<4x7xf32, #tpu.memory_space<vmem>>, vector<4x7xf32>
    %1 = tpu.concatenate %0, %0, %0 in 0 : vector<4x7xf32>, vector<4x7xf32>, vector<4x7xf32> -> vector<12x7xf32>
    %2 = tpu.concatenate %1, %1 in 1 : vector<12x7xf32>, vector<12x7xf32> -> vector<12x14xf32>
    %c0_1 = arith.constant 0 : index
    %c0_2 = arith.constant 0 : index
    %3 = vector.load %arg1[%c0_1, %c0_2] : memref<12x14xf32, #tpu.memory_space<vmem>>, vector<12x14xf32>
    tpu.vector_store %arg1[%c0_1, %c0_2], %2 {strides = array<i32>} : memref<12x14xf32, #tpu.memory_space<vmem>>, vector<12x14xf32>,
    return
  }
}

</mosaic_0001>

<bundles_post_ra>
// kernel: tpu_custom_call.1
= control target key start
LH: loop header
LB: loop body
LE: loop exit
PB: predicated region body
PF: predicated region fallthrough
CT: control target
= control target key end

     0   :  { %6 = vsyncpa [#allocation3], 0  ;;  %s150_s0 = inlined_call_operand.hbm [shape: f32[4,7], index: 0, kind: input, shape index: {}]   ;;  %s151_s1 = inlined_call_operand.hbm [shape: f32[12,14], index: 1, kind: output, shape index: {}]  }
   0x1   :  { %7 = vsyncpa [#allocation4], 0  ;;  %s111_s6 = smov [#allocation2]   ;;  %s63_s10 = scalar_lea.hbm %s150_s0, 64 }
   0x2   :  { %s14_s7 = sshll.u32 %s111_s6, 4  ;;  %p64_p0 = scmp.ne.s32.totalorder %s150_s0, %s63_s10  ;;  %s15_s7 = int_to_ptr.vmem [resolvable:$true] %s14_s7 }
   0x3   :  { %p67_p1 = scmp.lt.u32.totalorder %s63_s10, %s150_s0 }
   0x5   :  { %p69_p2 = pnand %p67_p1, %p64_p0 }
   0x7   :  { %72 = shalt.err (!%p69_p2)
}
   0x8   :  { %s73_s15 = scalar_lea.vmem %s15_s7, 64  ;;  %p78_p4 = scmp.lt.s32.totalorder %s15_s7, %s15_s7 }
   0x9   :  { %p74_p3 = scmp.ne.s32.totalorder %s15_s7, %s73_s15  ;;  %p79_p5 = scmp.lt.s32.totalorder %s73_s15, %s73_s15 }
   0xb   :  { %p80_p6 = por %p79_p5, %p78_p4 }
   0xd   :  { %p81_p7 = pnand %p80_p6, %p74_p3 }
   0xf   :  { %84 = shalt.err (!%p81_p7)
}
  0x10   :  { %17 = dma.hbm_to_vmem [thread:$0]  %s150_s0, 64, %s15_s7, [#allocation3]  }
  0x11   :  { %107 = dma.done.wait [#allocation3], 64  }
  0x12   :  { %108 = vsyncadd [#allocation3], 4294967232  ;;  %v21_v0 = vld [vmem:[#allocation2] sm:$0xf]  ;;  %vm25_vm0 = vcmask 1043456   ;;  %s112_s18 = smov 7  }
  0x13   :  { %v23_v1 = vrot.slane %v21_v0, 4  ;;  %vm34_vm1 = vcmask 56320   ;;  %vm37_vm2 = vcmask 113664   ;;  %s113_s19 = smov [#allocation5]   ;;  %vm39_vm3 = vcmask 109568  }
  0x14   :  { %s46_s20 = sshll.u32 %s113_s19, 4  ;;  %s47_s20 = int_to_ptr.vmem [resolvable:$true] %s46_s20 }
  0x15   :  { %v26_v2 = vsel %vm25_vm0, %v21_v0, %v23_v1  ;;  %s85_s0 = scalar_lea.vmem %s47_s20, 256  ;;  %p90_p9 = scmp.lt.s32.totalorder %s47_s20, %s47_s20 }
  0x16   :  { %28 = vrot.lane.b32.xlu0 %v26_v2, %s112_s18  ;;  %p86_p8 = scmp.ne.s32.totalorder %s47_s20, %s85_s0  ;;  %p91_p10 = scmp.lt.s32.totalorder %s85_s0, %s85_s0 }
  0x18   :  { %p92_p11 = por %p91_p10, %p90_p9 }
  0x1a   :  { %30 = vrot.lane.b32.xlu0 %v21_v0, %s112_s18  ;;  %p93_p12 = pnand %p92_p11, %p86_p8 }
  0x88   :  { %v29_v3 = vpop.permute.xlu0 %28 }
  0x89   :  { %v35_v4 = vsel %vm34_vm1, %v26_v2, %v29_v3 }
  0x8a   :  { %38 = vst.msk [vmem:[#allocation5] sm:$0xff] %vm37_vm2, %v35_v4 }
  0x8c   :  { %v31_v5 = vpop.permute.xlu0 %30 }
  0x8d   :  { %v36_v6 = vsel %vm34_vm1, %v21_v0, %v31_v5 }
  0x8e   :  { %40 = vst.msk [vmem:[#allocation5 + $0x8] sm:$0xf] %vm39_vm3, %v36_v6 }
  0x8f   :  { %96 = shalt.err (!%p93_p12)
}
  0x90   :  { %s97_s23 = scalar_lea.hbm %s151_s1, 256 }
  0x91   :  { %p98_p13 = scmp.ne.s32.totalorder %s151_s1, %s97_s23  ;;  %p101_p0 = scmp.lt.u32.totalorder %s97_s23, %s151_s1 }
  0x93   :  { %p103_p1 = pnand %p101_p0, %p98_p13 }
  0x95   :  { %106 = shalt.err (!%p103_p1)
}
  0x96   :  { %s114_s28 = smov 128   ;;  %s115_s29 = smov 8  }
  0x97   :  { %52 = dma.vmem_to_hbm [thread:$0]  %s47_s20, 256, %s151_s1, [#allocation4], %s114_s28, %s114_s28, %s115_s29  }
  0x98   :  { %109 = dma.done.wait [#allocation4], 256  }
  0x99   :  { %110 = vsyncadd [#allocation4], 4294967040 }
  0x9a   :  { %56 = vsyncpa [#allocation3], 1 }
  0x9b   :  { %57 = vsyncpa [#allocation4], 1 }

</bundles_post_ra>
